<compile_context>
chip_gen: v6e
topology: v6e:2x2x1
jax: 0.10.0
libtpu: 0.0.40
codegen_flags: <defaults>
</compile_context>

<pallas_src>
import functools

import jax
import jax.numpy as jnp
from jax.experimental import pallas as pl
from jax.experimental.pallas import tpu as pltpu

ATTENTION_DIM = 1024    # hard-coded in the PyTorch module's __init__
LANE = 128              # lane width: keep the output feature dim a multiple
CHUNK = 8               # rows processed per inner step (one f32 sublane group)
MAX_BLOCK_ROWS = 512    # diminishing returns past ~512 rows per grid step


def _round_up(x, m):
    return (x + m - 1) // m * m


def _vmem_budget_bytes():
    """Per-generation VMEM budget (leave ~25% headroom; cap at 100 MiB)."""
    try:
        cap = int(pltpu.get_tpu_info().vmem_capacity_bytes)
    except Exception:
        cap = 64 << 20  # conservative: assume a v7x-class 64 MiB TensorCore
    return min((cap * 3) // 4, 100 << 20)


def _select_block_rows(batch, n_regions, d_pad, buffer_budget_bytes):
    """Largest batch block (multiple of 8, <=512) whose double-buffered
    input + output tiles fit in the VMEM buffer budget."""
    per_row = 2 * n_regions * d_pad * 4 + 2 * d_pad * 4   # double-buffered in+out
    bb = buffer_budget_bytes // per_row
    bb = max((bb // CHUNK) * CHUNK, CHUNK)
    bb = min(bb, MAX_BLOCK_ROWS)
    bb = min(bb, _round_up(batch, CHUNK))  # don't pad batch beyond the next /8
    return max(bb, CHUNK)


def _image_attention_kernel(x_ref, w_ref, o_ref, *, bias):
    # x_ref : (BB, N, D)  block of batch rows (D lane-dense, multiple of 128)
    # w_ref : (1, D)      fused projection row  (w1 @ w2)^T
    # o_ref : (BB, D)
    # bias  : python float, fused bias (b1 @ w2 + b2), baked as a constant.
    w = w_ref[...]                                   # (1, D) f32, read once
    n_chunks = x_ref.shape[0] // CHUNK

    def body(c, carry):
        r0 = pl.multiple_of(c * CHUNK, CHUNK)
        x = x_ref[pl.ds(r0, CHUNK), :, :].astype(jnp.float32)     # (CHUNK, N, D)

        # Fused attention score: relu(x . w_fused + b_fused) — VPU multiply +
        # XLU lane reduction instead of a width-1 MXU matmul.
        s = jnp.sum(x * w, axis=-1) + bias                        # (CHUNK, N)
        s = jnp.maximum(s, 0.0)                                   # ReLU; Dropout = id (eval)

        # Softmax over regions (PyTorch dim=1 == last axis here).  The 1/denom
        # scale is applied AFTER the weighted sum, so alpha never materializes.
        s = s - jnp.max(s, axis=-1, keepdims=True)
        e = jnp.exp(s)                                            # (CHUNK, N)
        denom = jnp.sum(e, axis=-1, keepdims=True)                # (CHUNK, 1)
        r = pl.reciprocal(denom, approx=True)                     # EUP slot
        r = r * (2.0 - denom * r)                                 # Newton step -> f32 accuracy

        acc = jnp.sum(x * e[:, :, None], axis=1)                  # (CHUNK, D)
        o_ref[pl.ds(r0, CHUNK), :] = (acc * r).astype(o_ref.dtype)
        return carry

    # fori_loop (not a Python for) so live ranges stay bounded at large BB.
    jax.lax.fori_loop(0, n_chunks, body, 0, unroll=(n_chunks <= 4))


def make_image_attention(w1, b1, w2, b2):
    """One-time setup (call at parameter-load time, OUTSIDE jit).

    Precomputes the algebraic fusion of the two Linear layers (valid because
    there is no nonlinearity between them — ReLU comes after the 1-wide
    projection) and returns a jitted function  vis_input (B, N, D) -> (B, D)
    to be called every decoder timestep.
    """
    D = w1.shape[0]
    assert w1.shape == (D, ATTENTION_DIM)
    assert b1.shape == (ATTENTION_DIM,)
    assert w2.shape == (ATTENTION_DIM, 1)

    w1f = w1.astype(jnp.float32)
    w2f = w2.astype(jnp.float32)
    w_fused = (w1f @ w2f).reshape(1, D)                                  # (1, D)
    b_fused = float((b1.astype(jnp.float32) @ w2f + b2.astype(jnp.float32))[0])

    # Lane-dense feature dim (production D=2048 is already a multiple of 128).
    D_pad = _round_up(max(D, LANE), LANE)
    if D_pad != D:
        w_fused = jnp.pad(w_fused, ((0, 0), (0, D_pad - D)))

    vmem_limit = _vmem_budget_bytes()
    kernel = functools.partial(_image_attention_kernel, bias=b_fused)

    @jax.jit
    def apply(vis_input):
        B, N, D_in = vis_input.shape
        assert D_in == D
        x = vis_input
        if D_pad != D:
            x = jnp.pad(x, ((0, 0), (0, 0), (0, D_pad - D)))

        # Batch block sized from the VMEM budget (keep ~10% compiler headroom).
        BB = _select_block_rows(B, N, D_pad, int(vmem_limit * 0.9))
        num_blocks = pl.cdiv(B, BB)            # no forced 2-block padding
        B_pad = num_blocks * BB
        if B_pad != B:
            x = jnp.pad(x, ((0, B_pad - B), (0, 0), (0, 0)))

        out = pl.pallas_call(
            kernel,
            out_shape=jax.ShapeDtypeStruct((B_pad, D_pad), vis_input.dtype),
            grid_spec=pltpu.PrefetchScalarGridSpec(
                num_scalar_prefetch=0,
                grid=(num_blocks,),
                in_specs=[
                    pl.BlockSpec((BB, N, D_pad), lambda i: (i, 0, 0)),
                    pl.BlockSpec((1, D_pad), lambda i: (0, 0)),
                ],
                out_specs=pl.BlockSpec((BB, D_pad), lambda i: (i, 0)),
            ),
            compiler_params=pltpu.CompilerParams(
                dimension_semantics=("parallel",),
                vmem_limit_bytes=int(vmem_limit),
            ),
        )(x, w_fused)

        return out[:B, :D]

    return apply


def _reference(vis_input, w1, b1, w2, b2):
    """Pure-JAX reference matching the PyTorch forward (eval mode), unfused."""
    h = vis_input @ w1 + b1                      # (B, N, 1024)
    a = h @ w2 + b2                              # (B, N, 1)
    a = jnp.maximum(a, 0.0)                      # ReLU (Dropout identity)
    alpha = jax.nn.softmax(a, axis=1)            # softmax over regions
    return jnp.sum(vis_input * alpha, axis=1)    # (B, D)


if __name__ == "__main__":
    # Small shapes consistent with the module: batch=2, regions=16, input_dim=32
    B, N, D = 2, 16, 32

    key = jax.random.PRNGKey(0)
    k_x, k_w1, k_b1, k_w2, k_b2 = jax.random.split(key, 5)

    vis_input = jax.random.normal(k_x, (B, N, D), dtype=jnp.float32)
    # PyTorch stores Linear weights as (out,in); kept pre-transposed (in,out) here.
    w1 = jax.random.normal(k_w1, (D, ATTENTION_DIM), dtype=jnp.float32) * 0.05
    b1 = jax.random.normal(k_b1, (ATTENTION_DIM,), dtype=jnp.float32) * 0.05
    w2 = jax.random.normal(k_w2, (ATTENTION_DIM, 1), dtype=jnp.float32) * 0.05
    b2 = jax.random.normal(k_b2, (1,), dtype=jnp.float32) * 0.05

    # Fusion precompute hoisted out of the per-timestep path (done once here).
    attn_fn = make_image_attention(w1, b1, w2, b2)

    out = jax.block_until_ready(attn_fn(vis_input))

    ref = _reference(vis_input, w1, b1, w2, b2)
    assert out.shape == (B, D)
    assert jnp.allclose(out, ref, atol=1e-4, rtol=1e-4), "mismatch vs reference"

    print("KERNEL_OK")
</pallas_src>

<mosaic_0001>
module attributes {stable_mosaic.version = 11 : i64} {
  func.func @_image_attention_kernel(%arg0: i32, %arg1: memref<8x16x128xf32, #tpu.memory_space<vmem>>, %arg2: memref<1x128xf32, #tpu.memory_space<vmem>>, %arg3: memref<8x128xf32, #tpu.memory_space<vmem>>) attributes {dimension_semantics = [#tpu.dimension_semantics<parallel>], iteration_bounds = array<i64: 1>, scalar_prefetch = 0 : i64, scratch_operands = 0 : i64, tpu.core_type = #tpu.core_type<tc>, window_params = [{transform_indices = @transform_0, window_bounds = array<i64: 8, 16, 128>}, {pipeline_mode = #tpu.pipeline_mode<synchronous>, transform_indices = @transform_1, window_bounds = array<i64: 1, 128>}, {transform_indices = @transform_2, window_bounds = array<i64: 8, 128>}]} {
    %c0 = arith.constant 0 : index
    %c0_0 = arith.constant 0 : index
    %0 = vector.load %arg2[%c0, %c0_0] : memref<1x128xf32, #tpu.memory_space<vmem>>, vector<1x128xf32>
    %c0_i32 = arith.constant 0 : i32
    %c8_i32 = arith.constant 8 : i32
    %1 = arith.muli %c0_i32, %c8_i32 : i32
    %2 = tpu.assume_multiple %1, 8 : i32
    %3 = arith.index_cast %2 : i32 to index
    %c0_1 = arith.constant 0 : index
    %c0_2 = arith.constant 0 : index
    %4 = vector.load %arg1[%3, %c0_1, %c0_2] : memref<8x16x128xf32, #tpu.memory_space<vmem>>, vector<8x16x128xf32>
    %5 = vector.shape_cast %0 : vector<1x128xf32> to vector<1x1x128xf32>
    %6 = vector.broadcast %5 : vector<1x1x128xf32> to vector<8x16x128xf32>
    %7 = arith.mulf %4, %6 : vector<8x16x128xf32>
    %cst = arith.constant dense<0.000000e+00> : vector<8x16xf32>
    %8 = vector.multi_reduction <add>, %7, %cst [2] : vector<8x16x128xf32> to vector<8x16xf32>
    %cst_3 = arith.constant 0.040920984 : f32
    %9 = vector.broadcast %cst_3 : f32 to vector<8x16xf32>
    %10 = arith.addf %8, %9 : vector<8x16xf32>
    %cst_4 = arith.constant 0.000000e+00 : f32
    %11 = vector.broadcast %cst_4 : f32 to vector<8x16xf32>
    %12 = arith.maximumf %10, %11 : vector<8x16xf32>
    %cst_5 = arith.constant dense<0xFF800000> : vector<8xf32>
    %13 = vector.multi_reduction <maximumf>, %12, %cst_5 [1] : vector<8x16xf32> to vector<8xf32>
    %14 = vector.shape_cast %13 : vector<8xf32> to vector<8x1xf32>
    %15 = vector.broadcast %14 : vector<8x1xf32> to vector<8x16xf32>
    %16 = arith.subf %12, %15 : vector<8x16xf32>
    %17 = math.exp %16 : vector<8x16xf32>
    %cst_6 = arith.constant dense<0.000000e+00> : vector<8xf32>
    %18 = vector.multi_reduction <add>, %17, %cst_6 [1] : vector<8x16xf32> to vector<8xf32>
    %19 = vector.shape_cast %18 : vector<8xf32> to vector<8x1xf32>
    %20 = tpu.reciprocal %19 {approx = true} : vector<8x1xf32> -> vector<8x1xf32>
    %21 = arith.mulf %19, %20 : vector<8x1xf32>
    %cst_7 = arith.constant 2.000000e+00 : f32
    %22 = vector.broadcast %cst_7 : f32 to vector<8x1xf32>
    %23 = arith.subf %22, %21 : vector<8x1xf32>
    %24 = arith.mulf %20, %23 : vector<8x1xf32>
    %25 = vector.shape_cast %17 : vector<8x16xf32> to vector<8x16x1xf32>
    %26 = vector.broadcast %25 : vector<8x16x1xf32> to vector<8x16x128xf32>
    %27 = arith.mulf %4, %26 : vector<8x16x128xf32>
    %cst_8 = arith.constant dense<0.000000e+00> : vector<8x128xf32>
    %28 = vector.multi_reduction <add>, %27, %cst_8 [1] : vector<8x16x128xf32> to vector<8x128xf32>
    %29 = vector.broadcast %24 : vector<8x1xf32> to vector<8x128xf32>
    %30 = arith.mulf %28, %29 : vector<8x128xf32>
    %31 = arith.index_cast %2 : i32 to index
    %c0_9 = arith.constant 0 : index
    %32 = vector.load %arg3[%31, %c0_9] : memref<8x128xf32, #tpu.memory_space<vmem>>, vector<8x128xf32>
    tpu.vector_store %arg3[%31, %c0_9], %30 {strides = array<i32>} : memref<8x128xf32, #tpu.memory_space<vmem>>, vector<8x128xf32>,
    %c1_i32 = arith.constant 1 : i32
    return
  }
  func.func @transform_0(%arg0: i32) -> (i32, i32, i32) {
    %c0_i32 = arith.constant 0 : i32
    %c0_i32_0 = arith.constant 0 : i32
    %c0_i32_1 = arith.constant 0 : i32
    return %arg0, %c0_i32, %c0_i32_0 : i32, i32, i32
  }
  func.func @transform_1(%arg0: i32) -> (i32, i32) {
    %c0_i32 = arith.constant 0 : i32
    %c0_i32_0 = arith.constant 0 : i32
    %c0_i32_1 = arith.constant 0 : i32
    return %c0_i32, %c0_i32_0 : i32, i32
  }
  func.func @transform_2(%arg0: i32) -> (i32, i32) {
    %c0_i32 = arith.constant 0 : i32
    %c0_i32_0 = arith.constant 0 : i32
    return %arg0, %c0_i32 : i32, i32
  }
}

</mosaic_0001>

<bundles_post_ra>
// kernel: apply.1
= control target key start
LH: loop header
LB: loop body
LE: loop exit
PB: predicated region body
PF: predicated region fallthrough
CT: control target
= control target key end

     0   :  { %v132_v37 = vlaneseq  ;;  %vm143_vm0 = vcmask 130112   ;;  %vm208_vm1 = vcmask 1041409   ;;  %vm210_vm2 = vcmask 1042434   ;;  %s987_s0 = inlined_call_operand.vmem [shape: f32[8,16,128], index: 0, kind: input, shape index: {}]   ;;  %s988_s1 = inlined_call_operand.vmem [shape: f32[1,128], index: 1, kind: input, shape index: {}]   ;;  %s989_s2 = inlined_call_operand.vmem [shape: f32[8,128], index: 2, kind: output, shape index: {}]  }
   0x1   :  { %v607_v0 = vld [vmem:[%s988_s1] ss:$0 sm:$0xff]  ;;  %v667_v1 = vld [vmem:[%s987_s0 + $0x10] sm:$0xff]  ;;  %v679_v5 = vld [vmem:[%s987_s0 + $0x18] sm:$0xff]  ;;  %vm212_vm3 = vcmask 1043459   ;;  %vm214_vm4 = vcmask 1044484  }
   0x2   :  { %v672_v2 = vld [vmem:[%s987_s0] sm:$0xff]  ;;  %v38_v3 = vmul.f32 %v607_v0, %v667_v1  ;;  %v684_v6 = vld [vmem:[%s987_s0 + $0x8] sm:$0xff]  ;;  %v39_v7 = vmul.f32 %v607_v0, %v679_v5  ;;  %v703_v13 = vld [vmem:[%s987_s0 + $0x38] sm:$0xff]  ;;  %v133_v40 = vand.u32 127, %v132_v37  ;;  %v760_v44 = vshrl.u32 %v132_v37, 7 }
   0x3   :  { %v36_v4 = vmul.f32 %v607_v0, %v672_v2  ;;  %v37_v8 = vmul.f32 %v607_v0, %v684_v6  ;;  %v691_v9 = vld [vmem:[%s987_s0 + $0x28] sm:$0xff]  ;;  %v696_v10 = vld [vmem:[%s987_s0 + $0x20] sm:$0xff]  ;;  %v708_v14 = vld [vmem:[%s987_s0 + $0x30] sm:$0xff]  ;;  %v43_v15 = vmul.f32 %v607_v0, %v703_v13  ;;  %vm216_vm5 = vcmask 1045509  }
   0x4   :  { %56 = vadd.xlane.f32.xlu1 %v38_v3  ;;  %v41_v11 = vmul.f32 %v607_v0, %v691_v9  ;;  %v40_v12 = vmul.f32 %v607_v0, %v696_v10  ;;  %v42_v16 = vmul.f32 %v607_v0, %v708_v14  ;;  %v715_v17 = vld [vmem:[%s987_s0 + $0x48] sm:$0xff]  ;;  %v720_v18 = vld [vmem:[%s987_s0 + $0x40] sm:$0xff]  ;;  %v727_v21 = vld [vmem:[%s987_s0 + $0x58] sm:$0xff]  ;;  %v138_v43 = vadd.s32 4294967288, %v133_v40 }
   0x5   :  { %52 = vadd.xlane.f32.xlu0 %v36_v4  ;;  %v45_v19 = vmul.f32 %v607_v0, %v715_v17  ;;  %v44_v20 = vmul.f32 %v607_v0, %v720_v18  ;;  %v732_v22 = vld [vmem:[%s987_s0 + $0x50] sm:$0xff]  ;;  %v47_v23 = vmul.f32 %v607_v0, %v727_v21  ;;  %v739_v25 = vld [vmem:[%s987_s0 + $0x68] sm:$0xff]  ;;  %v744_v26 = vld [vmem:[%s987_s0 + $0x60] sm:$0xff]  ;;  %v788_v60 = vsub.s32 %v133_v40, %v760_v44 }
   0x6   :  { %v46_v24 = vmul.f32 %v607_v0, %v732_v22  ;;  %v49_v27 = vmul.f32 %v607_v0, %v739_v25  ;;  %v48_v28 = vmul.f32 %v607_v0, %v744_v26  ;;  %v751_v29 = vld [vmem:[%s987_s0 + $0x78] sm:$0xff]  ;;  %v756_v30 = vld [vmem:[%s987_s0 + $0x70] sm:$0xff]  ;;  %v779_v55 = vsub.s32 %v138_v43, %v760_v44 }
   0x7   :  { %v51_v31 = vmul.f32 %v607_v0, %v751_v29  ;;  %v50_v32 = vmul.f32 %v607_v0, %v756_v30  ;;  %vm218_vm6 = vcmask 1046534   ;;  %vm220_vm7 = vcmask 1047559  }
   0x8   :  { %58 = vadd.xlane.f32.xlu1 %v39_v7  ;;  %vm223_vm8 = vcmask 130048  }
   0x9   :  { %54 = vadd.xlane.f32.xlu0 %v37_v8 }
   0xc   :  { %62 = vadd.xlane.f32.xlu1 %v41_v11 }
   0xd   :  { %60 = vadd.xlane.f32.xlu0 %v40_v12 }
  0x10   :  { %66 = vadd.xlane.f32.xlu1 %v43_v15 }
  0x11   :  { %64 = vadd.xlane.f32.xlu0 %v42_v16 }
  0x14   :  { %70 = vadd.xlane.f32.xlu1 %v45_v19 }
  0x15   :  { %68 = vadd.xlane.f32.xlu0 %v44_v20 }
  0x18   :  { %74 = vadd.xlane.f32.xlu1 %v47_v23 }
  0x19   :  { %72 = vadd.xlane.f32.xlu0 %v46_v24 }
  0x1c   :  { %78 = vadd.xlane.f32.xlu1 %v49_v27 }
  0x1d   :  { %76 = vadd.xlane.f32.xlu0 %v48_v28 }
  0x20   :  { %82 = vadd.xlane.f32.xlu1 %v51_v31 }
  0x21   :  { %80 = vadd.xlane.f32.xlu0 %v50_v32 }
  0x8d   :  { %v57_v33 = vpop.xlane.xlu1 %56 }
  0x8e   :  { %v53_v34 = vpop.xlane.xlu0 %52  ;;  %v766_v47 = vadd.f32 0.040920984, %v57_v33 }
  0x8f   :  { %v768_v48 = vadd.f32 0.040920984, %v53_v34 }
  0x90   :  { %v102_v61 = vmax.f32 %v766_v47, 0.0  ;;  %v242_v47 = vsub.s32 3, %v760_v44 }
  0x91   :  { %v59_v35 = vpop.xlane.xlu1 %58  ;;  %v100_v62 = vmax.f32 %v768_v48, 0.0 }
  0x92   :  { %v55_v36 = vpop.xlane.xlu0 %54  ;;  %v762_v45 = vadd.f32 0.040920984, %v59_v35  ;;  %v148_v23 = vrot.slane %v102_v61, %v788_v60 }
  0x93   :  { %v764_v46 = vadd.f32 0.040920984, %v55_v36  ;;  %v137_v24 = vrot.slane %v100_v62, %v788_v60 }
  0x94   :  { %v103_v56 = vmax.f32 %v762_v45, 0.0 }
  0x95   :  { %v63_v38 = vpop.xlane.xlu1 %62  ;;  %v101_v57 = vmax.f32 %v764_v46, 0.0  ;;  %v258_v46 = vsub.s32 7, %v760_v44 }
  0x96   :  { %v61_v39 = vpop.xlane.xlu0 %60  ;;  %v770_v49 = vadd.f32 0.040920984, %v63_v38  ;;  %v152_v15 = vrot.slane %v103_v56, %v779_v55 }
  0x97   :  { %v772_v50 = vadd.f32 0.040920984, %v61_v39  ;;  %v142_v16 = vrot.slane %v101_v57, %v779_v55 }
  0x98   :  { %v105_v63 = vmax.f32 %v770_v49, 0.0  ;;  %v153_v39 = vsel %vm143_vm0, %v152_v15, %v148_v23 }
  0x99   :  { %v67_v41 = vpop.xlane.xlu1 %66  ;;  %v104_v0 = vmax.f32 %v772_v50, 0.0  ;;  %v144_v40 = vsel %vm143_vm0, %v142_v16, %v137_v24 }
  0x9a   :  { %v65_v42 = vpop.xlane.xlu0 %64  ;;  %v774_v51 = vadd.f32 0.040920984, %v67_v41  ;;  %v161_v31 = vrot.slane %v105_v63, %v779_v55 }
  0x9b   :  { %v776_v52 = vadd.f32 0.040920984, %v65_v42  ;;  %v157_v32 = vrot.slane %v104_v0, %v788_v60 }
  0x9c   :  { %v994_v3 = vmax.f32 %v774_v51, 0.0 }
  0x9d   :  { %v71_v53 = vpop.xlane.xlu1 %70  ;;  %v106_v4 = vmax.f32 %v776_v52, 0.0 }
  0x9e   :  { %v69_v54 = vpop.xlane.xlu0 %68  ;;  %v783_v58 = vadd.f32 0.040920984, %v71_v53  ;;  %v170_v33 = vrot.slane %v994_v3, %v779_v55 }
  0x9f   :  { %v785_v59 = vadd.f32 0.040920984, %v69_v54  ;;  %v166_v34 = vrot.slane %v106_v4, %v788_v60 }
  0xa0   :  { %v991_v19 = vmax.f32 %v783_v58, 0.0 }
  0xa1   :  { %v75_v7 = vpop.xlane.xlu1 %74  ;;  %v993_v20 = vmax.f32 %v785_v59, 0.0  ;;  %v171_v15 = vsel %vm143_vm0, %v170_v33, %v166_v34 }
  0xa2   :  { %v73_v8 = vpop.xlane.xlu0 %72  ;;  %v796_v11 = vadd.f32 0.040920984, %v75_v7  ;;  %v179_v41 = vrot.slane %v991_v19, %v779_v55  ;;  %v209_v19 = vsel %vm208_vm1, %v153_v39, %v144_v40 }
  0xa3   :  { %v798_v12 = vadd.f32 0.040920984, %v73_v8  ;;  %v175_v42 = vrot.slane %v993_v20, %v788_v60  ;;  %v162_v8 = vsel %vm143_vm0, %v161_v31, %v157_v32 }
  0xa4   :  { %v990_v27 = vmax.f32 %v796_v11, 0.0  ;;  %v211_v32 = vsel %vm210_vm2, %v162_v8, %v209_v19  ;;  %v645_v8 = vmov 0  }
  0xa5   :  { %v110_v28 = vmax.f32 %v798_v12, 0.0  ;;  %v79_v35 = vpop.xlane.xlu1 %78  ;;  %v180_v31 = vsel %vm143_vm0, %v179_v41, %v175_v42  ;;  %v213_v20 = vsel %vm212_vm3, %v171_v15, %v211_v32  ;;  %610 = vset.pattern.permute.xlu0 %v645_v8  ;;  %609 = vset.pattern.permute.xlu1 %v645_v8  ;;  %v230_v15 = vsub.s32 0, %v760_v44 }
  0xa6   :  { %v77_v36 = vpop.xlane.xlu0 %76  ;;  %v828_v37 = vadd.f32 0.040920984, %v79_v35  ;;  %v188_v43 = vrot.slane %v990_v27, %v779_v55  ;;  %v215_v41 = vsel %vm214_vm4, %v180_v31, %v213_v20  ;;  %v234_v20 = vsub.s32 1, %v760_v44 }
  0xa7   :  { %v830_v38 = vadd.f32 0.040920984, %v77_v36  ;;  %v184_v53 = vrot.slane %v110_v28, %v788_v60  ;;  %v238_v32 = vsub.s32 2, %v760_v44 }
  0xa8   :  { %v992_v54 = vmax.f32 %v828_v37, 0.0 }
  0xa9   :  { %v112_v7 = vmax.f32 %v830_v38, 0.0  ;;  %v83_v16 = vpop.xlane.xlu1 %82  ;;  %v189_v33 = vsel %vm143_vm0, %v188_v43, %v184_v53 }
  0xaa   :  { %v81_v23 = vpop.xlane.xlu0 %80  ;;  %v197_v24 = vrot.slane %v992_v54, %v779_v55  ;;  %v856_v36 = vadd.f32 0.040920984, %v83_v16  ;;  %v217_v19 = vsel %vm216_vm5, %v189_v33, %v215_v41 }
  0xab   :  { %v193_v35 = vrot.slane %v112_v7, %v788_v60  ;;  %v98_v27 = vadd.f32 0.040920984, %v81_v23 }
  0xac   :  { %v115_v34 = vmax.f32 %v856_v36, 0.0 }
  0xad   :  { %v114_v54 = vmax.f32 %v98_v27, 0.0  ;;  %v198_v3 = vsel %vm143_vm0, %v197_v24, %v193_v35  ;;  %v250_v35 = vsub.s32 5, %v760_v44 }
  0xae   :  { %v206_v39 = vrot.slane %v115_v34, %v779_v55  ;;  %v219_v27 = vsel %vm218_vm6, %v198_v3, %v217_v19 }
  0xaf   :  { %v202_v40 = vrot.slane %v114_v54, %v788_v60 }
  0xb1   :  { %v207_v42 = vsel %vm143_vm0, %v206_v39, %v202_v40  ;;  %v254_v39 = vsub.s32 6, %v760_v44 }
  0xb2   :  { %v221_v43 = vsel %vm220_vm7, %v207_v42, %v219_v27 }
  0xb3   :  { %v224_v53 = vsel %vm223_vm8, %v221_v43, -inf }
  0xb4   :  { %225 = vmax.xlane.f32.xlu0 %v224_v53 }
 0x13d   :  { %v226_v16 = vpop.xlane.xlu0 %225 }
 0x13e   :  { %v231_v23 = vrot.slane %v226_v16, %v230_v15  ;;  %v235_v24 = vrot.slane %v226_v16, %v234_v20  ;;  %v251_v40 = vrot.slane %v226_v16, %v250_v35  ;;  %v239_v42 = vrot.slane %v226_v16, %v238_v32 }
 0x13f   :  { %v259_v53 = vrot.slane %v226_v16, %v258_v46  ;;  %v243_v8 = vrot.slane %v226_v16, %v242_v47  ;;  %v999_v46 = vmax.f32 %v828_v37, 0.0 }
 0x140   :  { %v268_v3 = vsub.f32 %v100_v62, %v231_v23  ;;  %v269_v31 = vsub.f32 %v101_v57, %v231_v23  ;;  %v270_v33 = vsub.f32 %v102_v61, %v235_v24  ;;  %v271_v27 = vsub.f32 %v103_v56, %v235_v24 }
 0x141   :  { %v255_v57 = vrot.slane %v226_v16, %v254_v39  ;;  %v278_v62 = vsub.f32 %v110_v28, %v251_v40  ;;  %v272_v61 = vsub.f32 %v104_v0, %v239_v42  ;;  %v273_v15 = vsub.f32 %v105_v63, %v239_v42 }
 0x142   :  { %v284_v41 = vmul.f32 1.442695, %v268_v3  ;;  %v286_v19 = vmul.f32 1.442695, %v269_v31  ;;  %v288_v48 = vmul.f32 1.442695, %v270_v33  ;;  %v282_v12 = vsub.f32 %v114_v54, %v259_v53 }
 0x143   :  { %v290_v43 = vmul.f32 1.442695, %v271_v27  ;;  %v280_v45 = vsub.f32 %v112_v7, %v255_v57  ;;  %v304_v56 = vmul.f32 1.442695, %v278_v62  ;;  %v292_v20 = vmul.f32 1.442695, %v272_v61 }
 0x144   :  { %611 = vpow2.f32 %v284_v41  ;;  %v246_v23 = vsub.s32 4, %v760_v44  ;;  %v274_v50 = vsub.f32 %v106_v4, %v243_v8  ;;  %v294_v0 = vmul.f32 1.442695, %v273_v15 }
 0x145   :  { %613 = vpow2.f32 %v286_v19  ;;  %v308_v28 = vmul.f32 1.442695, %v280_v45  ;;  %v312_v7 = vmul.f32 1.442695, %v282_v12  ;;  %v995_v63 = vmax.f32 %v774_v51, 0.0 }
 0x146   :  { %615 = vpow2.f32 %v288_v48  ;;  %v247_v49 = vrot.slane %v226_v16, %v246_v23  ;;  %v296_v54 = vmul.f32 1.442695, %v274_v50  ;;  %v996_v44 = vmax.f32 %v785_v59, 0.0 }
 0x147   :  { %617 = vpow2.f32 %v290_v43  ;;  %v275_v35 = vsub.f32 %v995_v63, %v243_v8  ;;  %v997_v33 = vmax.f32 %v783_v58, 0.0  ;;  %v998_v19 = vmax.f32 %v796_v11, 0.0 }
 0x148   :  { %619 = vpow2.f32 %v304_v56  ;;  %v276_v52 = vsub.f32 %v996_v44, %v247_v49  ;;  %v281_v62 = vsub.f32 %v999_v46, %v255_v57  ;;  %v283_v61 = vsub.f32 %v115_v34, %v259_v53 }
 0x149   :  { %621 = vpow2.f32 %v292_v20  ;;  %v298_v4 = vmul.f32 1.442695, %v275_v35  ;;  %v277_v39 = vsub.f32 %v997_v33, %v247_v49  ;;  %v279_v42 = vsub.f32 %v998_v19, %v251_v40 }
 0x14a   :  { %623 = vpow2.f32 %v308_v28  ;;  %v300_v16 = vmul.f32 1.442695, %v276_v52  ;;  %v310_v11 = vmul.f32 1.442695, %v281_v62  ;;  %v314_v43 = vmul.f32 1.442695, %v283_v61 }
 0x14b   :  { %625 = vpow2.f32 %v294_v0  ;;  %v302_v59 = vmul.f32 1.442695, %v277_v39  ;;  %v306_v58 = vmul.f32 1.442695, %v279_v42 }
 0x14c   :  { %627 = vpow2.f32 %v312_v7 }
 0x14d   :  { %629 = vpow2.f32 %v296_v54 }
 0x14e   :  { %631 = vpow2.f32 %v298_v4 }
 0x14f   :  { %633 = vpow2.f32 %v300_v16 }
 0x150   :  { %635 = vpow2.f32 %v302_v59 }
 0x151   :  { %v612_v24 = vpop.eup %611  ;;  %637 = vpow2.f32 %v306_v58 }
 0x152   :  { %v614_v38 = vpop.eup %613  ;;  %333 = vperm.xlu1 %609, %v612_v24   ;;  %639 = vpow2.f32 %v310_v11 }
 0x153   :  { %336 = vperm.xlu0 %610, %v614_v38   ;;  %v616_v3 = vpop.eup %615  ;;  %641 = vpow2.f32 %v314_v43 }
 0x154   :  { %v618_v31 = vpop.eup %617 }
 0x155   :  { %v620_v32 = vpop.eup %619 }
 0x156   :  { %339 = vperm.xlu1 %609, %v616_v3   ;;  %v622_v51 = vpop.eup %621 }
 0x157   :  { %363 = vperm.xlu0 %610, %v620_v32   ;;  %v624_v41 = vpop.eup %623 }
 0x158   :  { %v626_v27 = vpop.eup %625 }
 0x159   :  { %v628_v48 = vpop.eup %627 }
 0x15a   :  { %342 = vperm.xlu1 %609, %v618_v31   ;;  %v630_v47 = vpop.eup %629 }
 0x15b   :  { %369 = vperm.xlu0 %610, %v624_v41   ;;  %v632_v40 = vpop.eup %631 }
 0x15c   :  { %v634_v45 = vpop.eup %633 }
 0x15d   :  { %v636_v56 = vpop.eup %635 }
 0x15e   :  { %345 = vperm.xlu1 %609, %v622_v51   ;;  %v638_v37 = vpop.eup %637 }
 0x15f   :  { %375 = vperm.xlu0 %610, %v628_v48   ;;  %v640_v57 = vpop.eup %639 }
 0x160   :  { %v642_v8 = vpop.eup %641 }
 0x162   :  { %348 = vperm.xlu1 %609, %v626_v27  }
 0x166   :  { %351 = vperm.xlu1 %609, %v630_v47  }
 0x16a   :  { %354 = vperm.xlu1 %609, %v632_v40  }
 0x16e   :  { %357 = vperm.xlu1 %609, %v634_v45  }
 0x172   :  { %360 = vperm.xlu1 %609, %v636_v56  }
 0x176   :  { %366 = vperm.xlu1 %609, %v638_v37  }
 0x17a   :  { %372 = vperm.xlu1 %609, %v640_v57  }
 0x17e   :  { %378 = vperm.xlu1 %609, %v642_v8  }
 0x1cd   :  { %v334_v15 = vpop.permute.xlu1 %333 }
 0x1ce   :  { %v337_v36 = vpop.permute.xlu0 %336  ;;  %v483_v34 = vmul.f32 %v334_v15, %v672_v2  ;;  %v383_v32 = vrot.slane %v334_v15, %v788_v60 }
 0x1cf   :  { %v484_v53 = vmul.f32 %v337_v36, %v684_v6  ;;  %v387_v31 = vrot.slane %v337_v36, %v779_v55 }
 0x1d1   :  { %v915_v20 = vadd.f32 %v484_v53, %v483_v34  ;;  %v340_v12 = vpop.permute.xlu1 %339  ;;  %v388_v48 = vsel %vm143_vm0, %v387_v31, %v383_v32 }
 0x1d2   :  { %v485_v23 = vmul.f32 %v340_v12, %v667_v1  ;;  %v392_v16 = vrot.slane %v340_v12, %v788_v60 }
 0x1d5   :  { %v343_v28 = vpop.permute.xlu1 %342 }
 0x1d6   :  { %v486_v50 = vmul.f32 %v343_v28, %v679_v5  ;;  %v364_v5 = vpop.permute.xlu0 %363 }
 0x1d7   :  { %v493_v39 = vmul.f32 %v364_v5, %v732_v22  ;;  %v428_v22 = vrot.slane %v364_v5, %v788_v60 }
 0x1d8   :  { %v919_v0 = vadd.f32 %v486_v50, %v485_v23 }
 0x1d9   :  { %v346_v24 = vpop.permute.xlu1 %345 }
 0x1da   :  { %v487_v49 = vmul.f32 %v346_v24, %v696_v10  ;;  %v370_v33 = vpop.permute.xlu0 %369 }
 0x1db   :  { %v495_v58 = vmul.f32 %v370_v33, %v744_v26  ;;  %v437_v40 = vrot.slane %v370_v33, %v788_v60 }
 0x1dd   :  { %v349_v38 = vpop.permute.xlu1 %348 }
 0x1de   :  { %v488_v7 = vmul.f32 %v349_v38, %v691_v9  ;;  %v396_v9 = vrot.slane %v343_v28, %v779_v55  ;;  %v376_v45 = vpop.permute.xlu0 %375 }
 0x1df   :  { %v446_v34 = vrot.slane %v376_v45, %v788_v60 }
 0x1e0   :  { %v923_v63 = vadd.f32 %v488_v7, %v487_v49  ;;  %v397_v19 = vsel %vm143_vm0, %v396_v9, %v392_v16  ;;  %v497_v7 = vmul.f32 %v376_v45, %v756_v30 }
 0x1e1   :  { %v352_v2 = vpop.permute.xlu1 %351  ;;  %v452_v43 = vsel %vm208_vm1, %v397_v19, %v388_v48 }
 0x1e2   :  { %v489_v35 = vmul.f32 %v352_v2, %v708_v14  ;;  %v405_v14 = vrot.slane %v349_v38, %v779_v55  ;;  %v410_v42 = vrot.slane %v352_v2, %v788_v60  ;;  %v514_v49 = vrot.slane %v923_v63, 4 }
 0x1e5   :  { %v355_v6 = vpop.permute.xlu1 %354 }
 0x1e6   :  { %v490_v54 = vmul.f32 %v355_v6, %v703_v13  ;;  %v414_v51 = vrot.slane %v355_v6, %v779_v55 }
 0x1e8   :  { %v927_v3 = vadd.f32 %v490_v54, %v489_v35  ;;  %v415_v47 = vsel %vm143_vm0, %v414_v51, %v410_v42 }
 0x1e9   :  { %v358_v1 = vpop.permute.xlu1 %357 }
 0x1ea   :  { %v491_v52 = vmul.f32 %v358_v1, %v720_v18  ;;  %v419_v62 = vrot.slane %v358_v1, %v788_v60  ;;  %v521_v2 = vrot.slane %v927_v3, 4 }
 0x1ec   :  { %v522_v30 = vadd.f32 %v521_v2, %v927_v3 }
 0x1ed   :  { %v361_v44 = vpop.permute.xlu1 %360 }
 0x1ee   :  { %v492_v4 = vmul.f32 %v361_v44, %v715_v17  ;;  %v401_v17 = vrot.slane %v346_v24, %v788_v60  ;;  %v423_v41 = vrot.slane %v361_v44, %v779_v55  ;;  %v500_v60 = vrot.slane %v915_v20, 4 }
 0x1f0   :  { %v527_v10 = vadd.f32 %v492_v4, %v491_v52  ;;  %v406_v46 = vsel %vm143_vm0, %v405_v14, %v401_v17  ;;  %v424_v56 = vsel %vm143_vm0, %v423_v41, %v419_v62  ;;  %v501_v5 = vadd.f32 %v500_v60, %v915_v20 }
 0x1f1   :  { %v367_v13 = vpop.permute.xlu1 %366  ;;  %v453_v37 = vsel %vm210_vm2, %v406_v46, %v452_v43 }
 0x1f2   :  { %v494_v18 = vmul.f32 %v367_v13, %v727_v21  ;;  %v432_v59 = vrot.slane %v367_v13, %v779_v55  ;;  %v454_v26 = vsel %vm212_vm3, %v415_v47, %v453_v37  ;;  %v528_v54 = vrot.slane %v527_v10, 4 }
 0x1f3   :  { %v455_v53 = vsel %vm214_vm4, %v424_v56, %v454_v26  ;;  %v502_v32 = vrot.slane %v501_v5, 2  ;;  %v523_v13 = vrot.slane %v522_v30, 2 }
 0x1f4   :  { %v534_v27 = vadd.f32 %v494_v18, %v493_v39  ;;  %v433_v57 = vsel %vm143_vm0, %v432_v59, %v428_v22  ;;  %v529_v9 = vadd.f32 %v528_v54, %v527_v10 }
 0x1f5   :  { %v373_v21 = vpop.permute.xlu1 %372  ;;  %v456_v12 = vsel %vm216_vm5, %v433_v57, %v455_v53  ;;  %v503_v17 = vadd.f32 %v502_v32, %v501_v5 }
 0x1f6   :  { %v441_v61 = vrot.slane %v373_v21, %v779_v55  ;;  %v496_v11 = vmul.f32 %v373_v21, %v739_v25  ;;  %v535_v1 = vrot.slane %v534_v27, 4  ;;  %v530_v51 = vrot.slane %v529_v9, 2 }
 0x1f7   :  { %v504_v48 = vrot.slane %v503_v17, 1 }
 0x1f8   :  { %v541_v8 = vadd.f32 %v496_v11, %v495_v58  ;;  %v442_v36 = vsel %vm143_vm0, %v441_v61, %v437_v40  ;;  %v536_v31 = vadd.f32 %v535_v1, %v534_v27  ;;  %v531_v3 = vadd.f32 %v530_v51, %v529_v9 }
 0x1f9   :  { %v379_v15 = vpop.permute.xlu1 %378  ;;  %v457_v23 = vsel %vm218_vm6, %v442_v36, %v456_v12  ;;  %v505_v11 = vadd.f32 %v504_v48, %v503_v17 }
 0x1fa   :  { %v450_v25 = vrot.slane %v379_v15, %v779_v55  ;;  %v498_v38 = vmul.f32 %v379_v15, %v751_v29  ;;  %v507_v55 = vrot.slane %v919_v0, 4  ;;  %v515_v29 = vadd.f32 %v514_v49, %v923_v63 }
 0x1fb   :  { %v542_v52 = vrot.slane %v541_v8, 4  ;;  %v537_v18 = vrot.slane %v536_v31, 2  ;;  %v532_v47 = vrot.slane %v531_v3, 1 }
 0x1fc   :  { %v451_v28 = vsel %vm143_vm0, %v450_v25, %v446_v34  ;;  %v548_v6 = vadd.f32 %v498_v38, %v497_v7  ;;  %v508_v44 = vadd.f32 %v507_v55, %v919_v0  ;;  %v516_v14 = vrot.slane %v515_v29, 2 }
 0x1fd   :  { %v458_v50 = vsel %vm220_vm7, %v451_v28, %v457_v23  ;;  %v543_v39 = vadd.f32 %v542_v52, %v541_v8  ;;  %v524_v0 = vadd.f32 %v523_v13, %v522_v30  ;;  %v538_v59 = vadd.f32 %v537_v18, %v536_v31 }
 0x1fe   :  { %v460_v24 = vsel %vm223_vm8, %v458_v50, 0.0  ;;  %v549_v4 = vrot.slane %v548_v6, 4  ;;  %v509_v33 = vrot.slane %v508_v44, 2  ;;  %v517_v41 = vadd.f32 %v516_v14, %v515_v29 }
 0x1ff   :  { %461 = vadd.xlane.f32.xlu0 %v460_v24  ;;  %v544_v19 = vrot.slane %v543_v39, 2  ;;  %v525_v46 = vrot.slane %v524_v0, 1  ;;  %v539_v61 = vrot.slane %v538_v59, 1  ;;  %v533_v34 = vadd.f32 %v532_v47, %v531_v3 }
 0x200   :  { %v550_v16 = vadd.f32 %v549_v4, %v548_v6  ;;  %v510_v20 = vadd.f32 %v509_v33, %v508_v44  ;;  %v518_v22 = vrot.slane %v517_v41, 1 }
 0x201   :  { %v545_v62 = vadd.f32 %v544_v19, %v543_v39  ;;  %v526_v56 = vadd.f32 %v525_v46, %v524_v0  ;;  %v540_v25 = vadd.f32 %v539_v61, %v538_v59 }
 0x202   :  { %v551_v63 = vrot.slane %v550_v16, 2  ;;  %v511_v10 = vrot.slane %v510_v20, 1  ;;  %v519_v45 = vadd.f32 %v518_v22, %v517_v41 }
 0x203   :  { %v546_v37 = vrot.slane %v545_v62, 1 }
 0x204   :  { %v552_v21 = vadd.f32 %v551_v63, %v550_v16  ;;  %v512_v40 = vadd.f32 %v511_v10, %v510_v20 }
 0x205   :  { %v547_v38 = vadd.f32 %v546_v37, %v545_v62 }
 0x206   :  { %v553_v57 = vrot.slane %v552_v21, 1 }
 0x208   :  { %v554_v7 = vadd.f32 %v553_v57, %v552_v21 }
 0x288   :  { %v462_v35 = vpop.xlane.xlu0 %461 }
 0x289   :  { %643 = vrcp.f32 %v462_v35 }
 0x296   :  { %v644_v42 = vpop.eup %643 }
 0x297   :  { %v464_v27 = vmul.f32 %v644_v42, %v462_v35 }
 0x299   :  { %v465_v58 = vsub.f32 2.0, %v464_v27 }
 0x29b   :  { %v466_v43 = vmul.f32 %v644_v42, %v465_v58 }
 0x29d   :  { %v556_v8 = vrot.slane %v466_v43, 1  ;;  %v557_v26 = vrot.slane %v466_v43, 2  ;;  %v558_v15 = vrot.slane %v466_v43, 3  ;;  %v559_v36 = vrot.slane %v466_v43, 4 }
 0x29e   :  { %v560_v53 = vrot.slane %v466_v43, 5  ;;  %v561_v12 = vrot.slane %v466_v43, 6  ;;  %v562_v28 = vrot.slane %v466_v43, 7  ;;  %v571_v55 = vmul.f32 %v505_v11, %v466_v43 }
 0x29f   :  { %v572_v23 = vmul.f32 %v556_v8, %v512_v40  ;;  %v573_v50 = vmul.f32 %v557_v26, %v519_v45  ;;  %v574_v24 = vmul.f32 %v558_v15, %v526_v56  ;;  %v575_v60 = vmul.f32 %v559_v36, %v533_v34 }
 0x2a0   :  { %v576_v49 = vmul.f32 %v560_v53, %v540_v25  ;;  %v577_v35 = vmul.f32 %v561_v12, %v547_v38  ;;  %v578_v54 = vmul.f32 %v562_v28, %v554_v7 }
 0x2a1   :  { %v587_v2 = vrot.slane %v572_v23, 7  ;;  %v589_v6 = vrot.slane %v573_v50, 6  ;;  %v591_v5 = vrot.slane %v574_v24, 5  ;;  %v593_v29 = vrot.slane %v575_v60, 4 }
 0x2a2   :  { %v595_v52 = vrot.slane %v576_v49, 3  ;;  %v597_v9 = vrot.slane %v577_v35, 2  ;;  %v599_v32 = vrot.slane %v578_v54, 1 }
 0x2a3   :  { %v588_v1 = vsel %vm208_vm1, %v587_v2, %v571_v55 }
 0x2a4   :  { %v590_v44 = vsel %vm210_vm2, %v589_v6, %v588_v1 }
 0x2a5   :  { %v592_v30 = vsel %vm212_vm3, %v591_v5, %v590_v44 }
 0x2a6   :  { %v594_v4 = vsel %vm214_vm4, %v593_v29, %v592_v30 }
 0x2a7   :  { %v596_v31 = vsel %vm216_vm5, %v595_v52, %v594_v4 }
 0x2a8   :  { %v598_v33 = vsel %vm218_vm6, %v597_v9, %v596_v31 }
 0x2a9   :  { %v600_v14 = vsel %vm220_vm7, %v599_v32, %v598_v33 }
 0x2aa   :  { %602 = vst [vmem:[%s989_s2] sm:$0xff] %v600_v14 }

</bundles_post_ra>
